<compile_context>
chip_gen: v6e
topology: v6e:2x2x1
jax: 0.10.0
libtpu: 0.0.40
codegen_flags: <defaults>
</compile_context>

<pallas_src>
import functools

import jax
import jax.numpy as jnp
from jax.experimental import pallas as pl
from jax.experimental.pallas import tpu as pltpu


def cnn1d_kernel(x_ref, w1b_ref, b1r_ref, p1_ref, w2b_ref, b2r_ref, p2_ref,
                 fw1t_ref, fb1_ref, fw2t_ref, fb2_ref, out_ref,
                 *, ker_size, pool_size, channel2, n_batch, c2):
    f32 = jnp.float32
    x = x_ref[...]                                  # (N, L)
    _, l_in = x.shape
    k_sz = ker_size

    # ---- conv1 + bias + ReLU: one MXU matmul -------------------------------
    l1 = l_in - k_sz + 1
    # tap-shifted operand; rows ordered (tap, batch) to match w1b's columns
    xcat = jnp.concatenate([x[:, k:k + l1] for k in range(k_sz)], axis=0)
    h1 = jnp.dot(w1b_ref[...], xcat, preferred_element_type=f32) + b1r_ref[...]
    h1 = jnp.maximum(h1, 0.0)                       # (N*C1, L1), rows (n, c)

    # ---- AvgPool1d(pool_size): one matmul vs constant pooling matrix -------
    h1p = jnp.dot(h1, p1_ref[...], preferred_element_type=f32)   # (N*C1, L2)
    l2 = l1 // pool_size

    # ---- conv2 + bias + ReLU: one MXU matmul (im2col over taps) ------------
    l3 = l2 - k_sz + 1
    acat = jnp.concatenate([h1p[:, k:k + l3] for k in range(k_sz)], axis=0)
    h2 = jnp.dot(w2b_ref[...], acat, preferred_element_type=f32) + b2r_ref[...]
    h2 = jnp.maximum(h2, 0.0)                       # (N*C2, L3), rows (n, o)

    # ---- AvgPool1d(pool_size) -----------------------------------------------
    h2p2d = jnp.dot(h2, p2_ref[...], preferred_element_type=f32)  # (N*C2, L4)
    l4 = l3 // pool_size
    h2p = h2p2d.reshape(n_batch, c2, l4)            # last dim preserved

    # ---- AdaptiveMaxPool1d(channel2) + flatten + fc1 as one matmul ----------
    bins = []
    for b in range(channel2):
        s = (b * l4) // channel2
        e = -(-((b + 1) * l4) // channel2)          # ceil division
        bins.append(jnp.max(h2p[:, :, s:e], axis=-1))   # (N, C2)
    flat = jnp.concatenate(bins, axis=1)            # (N, channel2*C2), bin-major
    y1 = jnp.dot(flat, fw1t_ref[...], preferred_element_type=f32) + fb1_ref[...]
    y1 = jnp.maximum(y1, 0.0)                       # (N, lin1)

    # ---- fc2 + softmax(dim=1) ------------------------------------------------
    z = jnp.dot(y1, fw2t_ref[...], preferred_element_type=f32) + fb2_ref[...]
    z = z - jnp.max(z, axis=1, keepdims=True)
    ez = jnp.exp(z)
    inv = pl.reciprocal(jnp.sum(ez, axis=1, keepdims=True))
    out_ref[...] = (ez * inv).astype(out_ref.dtype)


def cnn1d_forward(x, params, *, ker_size, pool_size, channel2):
    """Whole CNN_1d forward in one Pallas call. Wrapper work below is pure
    parameter/layout plumbing (no activation compute)."""
    w1, b1, w2, b2, fw1, fb1, fw2, fb2 = params
    f32 = jnp.float32
    n, c_in, l_in = x.shape
    assert c_in == 1
    c1 = w1.shape[0]
    c2 = w2.shape[0]
    lin1, fc1_in = fw1.shape
    out_size = fw2.shape[0]
    assert fc1_in == c2 * channel2, "fc1 expects flatten of (C2, channel2) bins"

    l1 = l_in - ker_size + 1
    l2 = l1 // pool_size
    l3 = l2 - ker_size + 1
    l4 = l3 // pool_size
    assert l1 >= 1 and l3 >= 1 and l4 >= 1, "input too short for conv/pool stack"

    eye_n = jnp.eye(n, dtype=f32)
    x2 = x.astype(f32).reshape(n, l_in)

    # conv1 as block-diagonal matmul: rows (n, c), cols (tap, n')
    w1b = jnp.einsum('ck,nm->nckm', w1.astype(f32).reshape(c1, ker_size),
                     eye_n).reshape(n * c1, ker_size * n)
    b1r = jnp.tile(b1.astype(f32), n).reshape(n * c1, 1)

    # conv2 as block-diagonal matmul: rows (n, o), cols (tap, n', c)
    w2b = jnp.einsum('ock,nm->nokmc', w2.astype(f32),
                     eye_n).reshape(n * c2, ker_size * n * c1)
    b2r = jnp.tile(b2.astype(f32), n).reshape(n * c2, 1)

    # constant average-pooling matrices (kernel == stride == pool, floor mode)
    def pool_matrix(li_, lo_):
        li = jnp.arange(li_, dtype=jnp.int32)[:, None]
        lo = jnp.arange(lo_, dtype=jnp.int32)[None, :]
        sel = (li >= lo * pool_size) & (li < (lo + 1) * pool_size)
        return jnp.where(sel, 1.0 / pool_size, 0.0).astype(f32)

    p1 = pool_matrix(l1, l2)
    p2 = pool_matrix(l3, l4)

    # fc1: permute columns from PyTorch's (channel-major, bin) flatten order to
    # the kernel's (bin-major, channel) order, then transpose -> (ch2*C2, lin1)
    fw1t = (fw1.astype(f32).reshape(lin1, c2, channel2)
            .transpose(0, 2, 1).reshape(lin1, channel2 * c2).T)
    fb1r = fb1.astype(f32).reshape(1, lin1)
    fw2t = fw2.astype(f32).T                        # (lin1, out_size)
    fb2r = fb2.astype(f32).reshape(1, out_size)

    kern = functools.partial(cnn1d_kernel, ker_size=ker_size,
                             pool_size=pool_size, channel2=channel2,
                             n_batch=n, c2=c2)
    vmem = pl.BlockSpec(memory_space=pltpu.MemorySpace.VMEM)
    return pl.pallas_call(
        kern,
        out_shape=jax.ShapeDtypeStruct((n, out_size), jnp.float32),
        in_specs=[vmem] * 11,
        out_specs=vmem,
    )(x2, w1b, b1r, p1, w2b, b2r, p2, fw1t, fb1r, fw2t, fb2r)


# ----------------------- pure-JAX reference (for checking) ------------------
def _conv1d_ref(x, w, b):
    n, _, l = x.shape
    _, _, k = w.shape
    lo = l - k + 1
    out = jnp.zeros((n, w.shape[0], lo), jnp.float32)
    for kk in range(k):
        out = out + jnp.einsum('ncl,oc->nol', x[:, :, kk:kk + lo], w[:, :, kk])
    return out + b[None, :, None]


def _avgpool_ref(x, p):
    n, c, l = x.shape
    lo = l // p
    return x[:, :, :lo * p].reshape(n, c, lo, p).mean(-1)


def reference_forward(x, params, ker_size, pool_size, channel2):
    w1, b1, w2, b2, fw1, fb1, fw2, fb2 = params
    h = jax.nn.relu(_conv1d_ref(x, w1, b1))
    h = _avgpool_ref(h, pool_size)
    h = jax.nn.relu(_conv1d_ref(h, w2, b2))
    h = _avgpool_ref(h, pool_size)
    l4 = h.shape[-1]
    bins = []
    for i in range(channel2):
        s = (i * l4) // channel2
        e = -(-((i + 1) * l4) // channel2)
        bins.append(h[:, :, s:e].max(-1))
    g = jnp.stack(bins, axis=-1)                 # (N, C2, channel2)
    flat = g.reshape(g.shape[0], -1)
    y = jax.nn.relu(flat @ fw1.T + fb1)
    z = y @ fw2.T + fb2
    return jax.nn.softmax(z, axis=1)


if __name__ == "__main__":
    # small, self-consistent hyperparameters
    channel1, channel2 = 4, 4
    lin1, out_size = 32, 8
    ker_size, pool_size = 3, 2
    N, L = 2, 64

    key = jax.random.PRNGKey(0)
    ks = jax.random.split(key, 9)
    x = jax.random.normal(ks[0], (N, 1, L), jnp.float32)
    w1 = jax.random.normal(ks[1], (channel1, 1, ker_size), jnp.float32) * 0.3
    b1 = jax.random.normal(ks[2], (channel1,), jnp.float32) * 0.1
    w2 = jax.random.normal(ks[3], (channel2, channel1, ker_size), jnp.float32) * 0.3
    b2 = jax.random.normal(ks[4], (channel2,), jnp.float32) * 0.1
    fw1 = jax.random.normal(ks[5], (lin1, channel2 * channel2), jnp.float32) * 0.2
    fb1 = jax.random.normal(ks[6], (lin1,), jnp.float32) * 0.1
    fw2 = jax.random.normal(ks[7], (out_size, lin1), jnp.float32) * 0.2
    fb2 = jax.random.normal(ks[8], (out_size,), jnp.float32) * 0.1
    params = (w1, b1, w2, b2, fw1, fb1, fw2, fb2)

    out = cnn1d_forward(x, params, ker_size=ker_size,
                        pool_size=pool_size, channel2=channel2)
    out = jax.block_until_ready(out)

    ref = reference_forward(x, params, ker_size, pool_size, channel2)
    assert out.shape == (N, out_size)
    assert bool(jnp.allclose(out, ref, atol=1e-5, rtol=1e-5))
    print("KERNEL_OK")
</pallas_src>

<mosaic_0001>
module attributes {stable_mosaic.version = 11 : i64} {
  func.func @cnn1d_kernel(%arg0: memref<2x64xf32, #tpu.memory_space<vmem>>, %arg1: memref<8x6xf32, #tpu.memory_space<vmem>>, %arg2: memref<8x1xf32, #tpu.memory_space<vmem>>, %arg3: memref<62x31xf32, #tpu.memory_space<vmem>>, %arg4: memref<8x24xf32, #tpu.memory_space<vmem>>, %arg5: memref<8x1xf32, #tpu.memory_space<vmem>>, %arg6: memref<29x14xf32, #tpu.memory_space<vmem>>, %arg7: memref<16x32xf32, #tpu.memory_space<vmem>>, %arg8: memref<1x32xf32, #tpu.memory_space<vmem>>, %arg9: memref<32x8xf32, #tpu.memory_space<vmem>>, %arg10: memref<1x8xf32, #tpu.memory_space<vmem>>, %arg11: memref<2x8xf32, #tpu.memory_space<vmem>>) attributes {dimension_semantics = [], scalar_prefetch = 0 : i64, scratch_operands = 0 : i64, tpu.core_type = #tpu.core_type<tc>} {
    %c0 = arith.constant 0 : index
    %c0_0 = arith.constant 0 : index
    %0 = vector.load %arg0[%c0, %c0_0] : memref<2x64xf32, #tpu.memory_space<vmem>>, vector<2x64xf32>
    %1 = vector.extract_strided_slice %0 {offsets = [0, 0], sizes = [2, 62], strides = [1, 1]} : vector<2x64xf32> to vector<2x62xf32>
    %2 = vector.extract_strided_slice %0 {offsets = [0, 1], sizes = [2, 62], strides = [1, 1]} : vector<2x64xf32> to vector<2x62xf32>
    %3 = vector.extract_strided_slice %0 {offsets = [0, 2], sizes = [2, 62], strides = [1, 1]} : vector<2x64xf32> to vector<2x62xf32>
    %4 = tpu.concatenate %1, %2, %3 in 0 : vector<2x62xf32>, vector<2x62xf32>, vector<2x62xf32> -> vector<6x62xf32>
    %c0_1 = arith.constant 0 : index
    %c0_2 = arith.constant 0 : index
    %5 = vector.load %arg1[%c0_1, %c0_2] : memref<8x6xf32, #tpu.memory_space<vmem>>, vector<8x6xf32>
    %cst = arith.constant dense<0.000000e+00> : vector<8x62xf32>
    %6 = tpu.matmul %5, %4, %cst {dimension_numbers = #tpu.dot_dimension_numbers<[1], [0], [0], [1], [0, 0, 1, 1], [], []>} : vector<8x6xf32>, vector<6x62xf32>, vector<8x62xf32> -> vector<8x62xf32>
    %c0_3 = arith.constant 0 : index
    %c0_4 = arith.constant 0 : index
    %7 = vector.load %arg2[%c0_3, %c0_4] : memref<8x1xf32, #tpu.memory_space<vmem>>, vector<8x1xf32>
    %8 = vector.broadcast %7 : vector<8x1xf32> to vector<8x62xf32>
    %9 = arith.addf %6, %8 : vector<8x62xf32>
    %cst_5 = arith.constant 0.000000e+00 : f32
    %10 = vector.broadcast %cst_5 : f32 to vector<8x62xf32>
    %11 = arith.maximumf %9, %10 : vector<8x62xf32>
    %c0_6 = arith.constant 0 : index
    %c0_7 = arith.constant 0 : index
    %12 = vector.load %arg3[%c0_6, %c0_7] : memref<62x31xf32, #tpu.memory_space<vmem>>, vector<62x31xf32>
    %cst_8 = arith.constant dense<0.000000e+00> : vector<8x31xf32>
    %13 = tpu.matmul %11, %12, %cst_8 {dimension_numbers = #tpu.dot_dimension_numbers<[1], [0], [0], [1], [0, 0, 1, 1], [], []>} : vector<8x62xf32>, vector<62x31xf32>, vector<8x31xf32> -> vector<8x31xf32>
    %14 = vector.extract_strided_slice %13 {offsets = [0, 0], sizes = [8, 29], strides = [1, 1]} : vector<8x31xf32> to vector<8x29xf32>
    %15 = vector.extract_strided_slice %13 {offsets = [0, 1], sizes = [8, 29], strides = [1, 1]} : vector<8x31xf32> to vector<8x29xf32>
    %16 = vector.extract_strided_slice %13 {offsets = [0, 2], sizes = [8, 29], strides = [1, 1]} : vector<8x31xf32> to vector<8x29xf32>
    %17 = tpu.concatenate %14, %15, %16 in 0 : vector<8x29xf32>, vector<8x29xf32>, vector<8x29xf32> -> vector<24x29xf32>
    %c0_9 = arith.constant 0 : index
    %c0_10 = arith.constant 0 : index
    %18 = vector.load %arg4[%c0_9, %c0_10] : memref<8x24xf32, #tpu.memory_space<vmem>>, vector<8x24xf32>
    %cst_11 = arith.constant dense<0.000000e+00> : vector<8x29xf32>
    %19 = tpu.matmul %18, %17, %cst_11 {dimension_numbers = #tpu.dot_dimension_numbers<[1], [0], [0], [1], [0, 0, 1, 1], [], []>} : vector<8x24xf32>, vector<24x29xf32>, vector<8x29xf32> -> vector<8x29xf32>
    %c0_12 = arith.constant 0 : index
    %c0_13 = arith.constant 0 : index
    %20 = vector.load %arg5[%c0_12, %c0_13] : memref<8x1xf32, #tpu.memory_space<vmem>>, vector<8x1xf32>
    %21 = vector.broadcast %20 : vector<8x1xf32> to vector<8x29xf32>
    %22 = arith.addf %19, %21 : vector<8x29xf32>
    %cst_14 = arith.constant 0.000000e+00 : f32
    %23 = vector.broadcast %cst_14 : f32 to vector<8x29xf32>
    %24 = arith.maximumf %22, %23 : vector<8x29xf32>
    %c0_15 = arith.constant 0 : index
    %c0_16 = arith.constant 0 : index
    %25 = vector.load %arg6[%c0_15, %c0_16] : memref<29x14xf32, #tpu.memory_space<vmem>>, vector<29x14xf32>
    %cst_17 = arith.constant dense<0.000000e+00> : vector<8x14xf32>
    %26 = tpu.matmul %24, %25, %cst_17 {dimension_numbers = #tpu.dot_dimension_numbers<[1], [0], [0], [1], [0, 0, 1, 1], [], []>} : vector<8x29xf32>, vector<29x14xf32>, vector<8x14xf32> -> vector<8x14xf32>
    %27 = vector.shape_cast %26 : vector<8x14xf32> to vector<2x4x14xf32>
    %28 = vector.extract_strided_slice %27 {offsets = [0, 0, 0], sizes = [2, 4, 4], strides = [1, 1, 1]} : vector<2x4x14xf32> to vector<2x4x4xf32>
    %cst_18 = arith.constant dense<0xFF800000> : vector<2x4xf32>
    %29 = vector.multi_reduction <maximumf>, %28, %cst_18 [2] : vector<2x4x4xf32> to vector<2x4xf32>
    %30 = vector.extract_strided_slice %27 {offsets = [0, 0, 3], sizes = [2, 4, 4], strides = [1, 1, 1]} : vector<2x4x14xf32> to vector<2x4x4xf32>
    %cst_19 = arith.constant dense<0xFF800000> : vector<2x4xf32>
    %31 = vector.multi_reduction <maximumf>, %30, %cst_19 [2] : vector<2x4x4xf32> to vector<2x4xf32>
    %32 = vector.extract_strided_slice %27 {offsets = [0, 0, 7], sizes = [2, 4, 4], strides = [1, 1, 1]} : vector<2x4x14xf32> to vector<2x4x4xf32>
    %cst_20 = arith.constant dense<0xFF800000> : vector<2x4xf32>
    %33 = vector.multi_reduction <maximumf>, %32, %cst_20 [2] : vector<2x4x4xf32> to vector<2x4xf32>
    %34 = vector.extract_strided_slice %27 {offsets = [0, 0, 10], sizes = [2, 4, 4], strides = [1, 1, 1]} : vector<2x4x14xf32> to vector<2x4x4xf32>
    %cst_21 = arith.constant dense<0xFF800000> : vector<2x4xf32>
    %35 = vector.multi_reduction <maximumf>, %34, %cst_21 [2] : vector<2x4x4xf32> to vector<2x4xf32>
    %36 = tpu.concatenate %29, %31, %33, %35 in 1 : vector<2x4xf32>, vector<2x4xf32>, vector<2x4xf32>, vector<2x4xf32> -> vector<2x16xf32>
    %c0_22 = arith.constant 0 : index
    %c0_23 = arith.constant 0 : index
    %37 = vector.load %arg7[%c0_22, %c0_23] : memref<16x32xf32, #tpu.memory_space<vmem>>, vector<16x32xf32>
    %cst_24 = arith.constant dense<0.000000e+00> : vector<2x32xf32>
    %38 = tpu.matmul %36, %37, %cst_24 {dimension_numbers = #tpu.dot_dimension_numbers<[1], [0], [0], [1], [0, 0, 1, 1], [], []>} : vector<2x16xf32>, vector<16x32xf32>, vector<2x32xf32> -> vector<2x32xf32>
    %c0_25 = arith.constant 0 : index
    %c0_26 = arith.constant 0 : index
    %39 = vector.load %arg8[%c0_25, %c0_26] : memref<1x32xf32, #tpu.memory_space<vmem>>, vector<1x32xf32>
    %40 = vector.broadcast %39 : vector<1x32xf32> to vector<2x32xf32>
    %41 = arith.addf %38, %40 : vector<2x32xf32>
    %cst_27 = arith.constant 0.000000e+00 : f32
    %42 = vector.broadcast %cst_27 : f32 to vector<2x32xf32>
    %43 = arith.maximumf %41, %42 : vector<2x32xf32>
    %c0_28 = arith.constant 0 : index
    %c0_29 = arith.constant 0 : index
    %44 = vector.load %arg9[%c0_28, %c0_29] : memref<32x8xf32, #tpu.memory_space<vmem>>, vector<32x8xf32>
    %cst_30 = arith.constant dense<0.000000e+00> : vector<2x8xf32>
    %45 = tpu.matmul %43, %44, %cst_30 {dimension_numbers = #tpu.dot_dimension_numbers<[1], [0], [0], [1], [0, 0, 1, 1], [], []>} : vector<2x32xf32>, vector<32x8xf32>, vector<2x8xf32> -> vector<2x8xf32>
    %c0_31 = arith.constant 0 : index
    %c0_32 = arith.constant 0 : index
    %46 = vector.load %arg10[%c0_31, %c0_32] : memref<1x8xf32, #tpu.memory_space<vmem>>, vector<1x8xf32>
    %47 = vector.broadcast %46 : vector<1x8xf32> to vector<2x8xf32>
    %48 = arith.addf %45, %47 : vector<2x8xf32>
    %cst_33 = arith.constant dense<0xFF800000> : vector<2xf32>
    %49 = vector.multi_reduction <maximumf>, %48, %cst_33 [1] : vector<2x8xf32> to vector<2xf32>
    %50 = vector.shape_cast %49 : vector<2xf32> to vector<2x1xf32>
    %51 = vector.broadcast %50 : vector<2x1xf32> to vector<2x8xf32>
    %52 = arith.subf %48, %51 : vector<2x8xf32>
    %53 = math.exp %52 : vector<2x8xf32>
    %cst_34 = arith.constant dense<0.000000e+00> : vector<2xf32>
    %54 = vector.multi_reduction <add>, %53, %cst_34 [1] : vector<2x8xf32> to vector<2xf32>
    %55 = vector.shape_cast %54 : vector<2xf32> to vector<2x1xf32>
    %56 = tpu.reciprocal %55 : vector<2x1xf32> -> vector<2x1xf32>
    %57 = vector.broadcast %56 : vector<2x1xf32> to vector<2x8xf32>
    %58 = arith.mulf %53, %57 : vector<2x8xf32>
    %c0_35 = arith.constant 0 : index
    %c0_36 = arith.constant 0 : index
    %59 = vector.load %arg11[%c0_35, %c0_36] : memref<2x8xf32, #tpu.memory_space<vmem>>, vector<2x8xf32>
    tpu.vector_store %arg11[%c0_35, %c0_36], %58 {strides = array<i32>} : memref<2x8xf32, #tpu.memory_space<vmem>>, vector<2x8xf32>,
    return
  }
}

</mosaic_0001>

<bundles_post_ra>
// kernel: tpu_custom_call.1
= control target key start
LH: loop header
LB: loop body
LE: loop exit
PB: predicated region body
PF: predicated region fallthrough
CT: control target
= control target key end

     0   :  { %v817_v2 = vmov 0.0   ;;  %s818_s23 = smov 127   ;;  %vm64_vm0 = vcmask 1045504   ;;  %vm819_vm1 = vmmov 0   ;;  %v820_v7 = vmov 0   ;;  %s1006_s0 = inlined_call_operand.vmem [shape: f32[2,64], index: 0, kind: input, shape index: {}]   ;;  %s1007_s1 = inlined_call_operand.vmem [shape: f32[8,6], index: 1, kind: input, shape index: {}]   ;;  %s1008_s2 = inlined_call_operand.vmem [shape: f32[8,1], index: 2, kind: input, shape index: {}]   ;;  %s1009_s3 = inlined_call_operand.vmem [shape: f32[62,31], index: 3, kind: input, shape index: {}]   ;;  %s1010_s4 = inlined_call_operand.vmem [shape: f32[8,24], index: 4, kind: input, shape index: {}]   ;;  %s1011_s5 = inlined_call_operand.vmem [shape: f32[8,1], index: 5, kind: input, shape index: {}]   ;;  %s1012_s6 = inlined_call_operand.vmem [shape: f32[29,14], index: 6, kind: input, shape index: {}]   ;;  %s1013_s7 = inlined_call_operand.vmem [shape: f32[16,32], index: 7, kind: input, shape index: {}]   ;;  %s1014_s8 = inlined_call_operand.vmem [shape: f32[1,32], index: 8, kind: input, shape index: {}]   ;;  %s1015_s9 = inlined_call_operand.vmem [shape: f32[32,8], index: 9, kind: input, shape index: {}]   ;;  %s1016_s10 = inlined_call_operand.vmem [shape: f32[1,8], index: 10, kind: input, shape index: {}]   ;;  %s1017_s11 = inlined_call_operand.hbm [shape: f32[2,8], index: 11, kind: output, shape index: {}]  }
   0x1   :  { %v39_v0 = vld [vmem:[%s1006_s0] sm:$0x3]  ;;  %721 = vmatprep.subr.mxu0 %v817_v2  ;;  %726 = vmatprep.subr.mxu1 %v817_v2  ;;  %v146_v4 = vld [vmem:[%s1009_s3 + $0x38] sm:$0x3f]  ;;  %v145_v6 = vld [vmem:[%s1009_s3 + $0x30] sm:$0xff] }
   0x2   :  { %v41_v1 = vrot.slane %v39_v0, 6  ;;  %v54_v3 = vld [vmem:[%s1008_s2] sm:$0xff]  ;;  %v45_v5 = vrot.slane %v39_v0, 4  ;;  %723 = vmatprep.mubr.msk.f32.mxu0 %vm819_vm1, %v817_v2  ;;  %789 = vset.pattern.permute.xlu1 %v820_v7 }
   0x3   :  { %727 = vmatpush3.msk.msra.mxu1 %vm64_vm0, %v146_v4 }
   0x4   :  { %42 = vrot.lane.b32.xlu0 %v41_v1, %s818_s23 }
   0x5   :  { %16 = vsyncpa [#allocation3], 0  ;;  %57 = vperm.xlu1 %789, %v54_v3   ;;  %728 = vmatprep.subr.mxu1 %v817_v2  ;;  %v144_v8 = vld [vmem:[%s1009_s3 + $0x28] sm:$0xff]  ;;  %s821_s26 = smov 126   ;;  %v143_v9 = vld [vmem:[%s1009_s3 + $0x20] sm:$0xff]  ;;  %vm49_vm2 = vcmask 1041408   ;;  %v428_v53 = vlaneseq }
   0x6   :  { %729 = vmatpush3.msra.mxu1 %v145_v6  ;;  %742 = vmatprep.mubr.msk.f32.mxu1 %vm819_vm1, %v817_v2  ;;  %v142_v10 = vld [vmem:[%s1009_s3 + $0x18] sm:$0xff]  ;;  %v141_v11 = vld [vmem:[%s1009_s3 + $0x10] sm:$0xff]  ;;  %vm51_vm3 = vcmask 1043456   ;;  %v53_v15 = vld [vmem:[%s1007_s1] sm:$0xff]  ;;  %vm60_vm4 = vcmask 48128   ;;  %vm147_vm5 = vcmask 506880  }
   0x7   :  { %730 = vmatprep.subr.mxu1 %v817_v2  ;;  %790 = vset.pattern.permute.xlu0 %v820_v7  ;;  %v140_v17 = vld [vmem:[%s1009_s3 + $0x8] sm:$0xff]  ;;  %v139_v18 = vld [vmem:[%s1009_s3] sm:$0xff]  ;;  %vm238_vm6 = vcmask 195584   ;;  %v316_v30 = vld [vmem:[%s1012_s6 + $0x18] sm:$0x1f]  ;;  %vm321_vm7 = vcmask 1044480  }
   0x8   :  { %46 = vrot.lane.b32.xlu0 %v45_v5, %s821_s26  ;;  %731 = vmatpush3.msra.mxu1 %v144_v8  ;;  %v232_v26 = vld [vmem:[%s1011_s5] sm:$0xff]  ;;  %v315_v31 = vld [vmem:[%s1012_s6 + $0x10] sm:$0xff]  ;;  %v314_v32 = vld [vmem:[%s1012_s6 + $0x8] sm:$0xff]  ;;  %vm317_vm8 = vcmask 236544   ;;  %vm412_vm9 = vcmask 85048   ;;  %vm398_vm10 = vcmask 27648  }
   0x9   :  { %732 = vmatprep.subr.mxu1 %v817_v2  ;;  %v231_v29 = vld [vmem:[%s1010_s4] sm:$0xff]  ;;  %vm405_vm11 = vcmask 52248   ;;  %vm419_vm12 = vcmask 109648   ;;  %v487_v50 = vld [vmem:[%s1013_s7 + $0x8] sm:$0xff]  ;;  %v573_v52 = vld [vmem:[%s1015_s9 + $0x18] sm:$0xff]  ;;  %v429_v55 = vand.u32 127, %v428_v53 }
   0xa   :  { %733 = vmatpush3.msra.mxu1 %v143_v9  ;;  %v313_v33 = vld [vmem:[%s1012_s6] sm:$0xff]  ;;  %v431_v59 = vshrl.u32 %v428_v53, 7  ;;  %vm438_vm13 = vcmask 1041409   ;;  %vm480_vm14 = vcmask 31744   ;;  %vm482_vm15 = vcmask 64512  }
   0xb   :  { %734 = vmatprep.subr.mxu1 %v817_v2  ;;  %v486_v51 = vld [vmem:[%s1013_s7] sm:$0xff]  ;;  %v443_v58 = vadd.s32 4294967292, %v429_v55  ;;  %v456_v60 = vadd.s32 4294967288, %v429_v55 }
   0xc   :  { %735 = vmatpush3.msra.mxu1 %v142_v10  ;;  %v432_v3 = vsub.s32 %v429_v55, %v431_v59 }
   0xd   :  { %736 = vmatprep.subr.mxu1 %v817_v2  ;;  %v446_v63 = vsub.s32 %v443_v58, %v431_v59  ;;  %v459_v1 = vsub.s32 %v456_v60, %v431_v59 }
   0xe   :  { %737 = vmatpush3.msra.mxu1 %v141_v11 }
   0xf   :  { %738 = vmatprep.subr.mxu1 %v817_v2 }
  0x10   :  { %739 = vmatpush3.msra.mxu1 %v140_v17 }
  0x11   :  { %740 = vmatprep.subr.mxu1 %v817_v2 }
  0x12   :  { %741 = vmatpush3.msra.mxu1 %v139_v18 }
  0x13   :  { %772 = vmatprep.subr.mxu1 %v817_v2 }
  0x76   :  { %v43_v12 = vpop.permute.xlu0 %42 }
  0x77   :  { %v50_v13 = vsel %vm49_vm2, %v39_v0, %v43_v12  ;;  %v469_v0 = vadd.s32 4294967284, %v429_v55  ;;  %vm581_vm2 = vcmask 261120  }
  0x79   :  { %v472_v8 = vsub.s32 %v469_v0, %v431_v59 }
  0x7a   :  { %v47_v14 = vpop.permute.xlu0 %46 }
  0x7b   :  { %v52_v16 = vsel %vm51_vm3, %v50_v13, %v47_v14  ;;  %vm655_vm3 = vcmask 58368  }
  0x7c   :  { %722 = vmatpush3.msk.msra.mxu0 %vm64_vm0, %v52_v16  ;;  %vm484_vm0 = vcmask 97280  }
  0x7d   :  { %724 = vmatmul.mubr.msk.f32.vlgmr.msra.gmra.mxu0 %vm60_vm4, %v53_v15  ;;  %745 = vmatprep.subr.mxu0 %v817_v2 }
  0x7e   :  { %751 = vmatprep.mubr.msk.f32.mxu0 %vm819_vm1, %v817_v2 }
  0x80   :  { %v58_v19 = vpop.permute.xlu1 %57 }
 0x13d   :  { %v134_v20 = vpop.f32.mrf.mxu0 }
 0x13e   :  { %v135_v21 = vadd.f32 %v134_v20, %v58_v19 }
 0x13f   :  { %v725_v22 = vpop.f32.mrf.mxu0 }
 0x140   :  { %v138_v23 = vmax.f32 %v135_v21, 0.0 }
 0x142   :  { %743 = vmatmul.mubr.msk.f32.vlgmr.msra.gmra.mxu1 %vm147_vm5, %v138_v23  ;;  %v572_v23 = vld [vmem:[%s1015_s9 + $0x10] sm:$0xff] }
 0x143   :  { %780 = vmatprep.mubr.msk.f32.mxu1 %vm819_vm1, %v817_v2  ;;  %773 = vmatpush3.msra.mxu1 %v573_v52 }
 0x144   :  { %774 = vmatprep.subr.mxu1 %v817_v2 }
 0x145   :  { %775 = vmatpush3.msra.mxu1 %v572_v23 }
 0x146   :  { %776 = vmatprep.subr.mxu1 %v817_v2 }
 0x202   :  { %v220_v24 = vpop.f32.mrf.mxu1 }
 0x203   :  { %225 = vrot.lane.b32.xlu0 %v220_v24, %s818_s23  ;;  %228 = vrot.lane.b32.xlu1 %v220_v24, %s821_s26 }
 0x204   :  { %v744_v25 = vpop.f32.mrf.mxu1 }
 0x205   :  { %v570_v25 = vld [vmem:[%s1015_s9] sm:$0xff] }
 0x207   :  { %235 = vperm.xlu1 %789, %v232_v26   ;;  %v689_v26 = vld [vmem:[%s1014_s8] ss:$0 sm:$0xff]  ;;  %s822_s8 = smov [#allocation2]  }
 0x275   :  { %v229_v27 = vpop.permute.xlu1 %228  ;;  %v226_v28 = vpop.permute.xlu0 %225 }
 0x276   :  { %746 = vmatpush3.msra.mxu0 %v229_v27 }
 0x277   :  { %747 = vmatprep.subr.mxu0 %v817_v2 }
 0x278   :  { %748 = vmatpush3.msra.mxu0 %v226_v28 }
 0x279   :  { %749 = vmatprep.subr.mxu0 %v817_v2 }
 0x27a   :  { %750 = vmatpush3.msra.mxu0 %v220_v24  ;;  %v571_v24 = vld [vmem:[%s1015_s9 + $0x8] sm:$0xff]  ;;  %s674_s9 = sshll.u32 %s822_s8, 4  ;;  %s675_s9 = int_to_ptr.vmem [resolvable:$true] %s674_s9 }
 0x27b   :  { %752 = vmatmul.mubr.msk.f32.vlgmr.msra.gmra.mxu0 %vm238_vm6, %v231_v29  ;;  %754 = vmatprep.subr.mxu0 %v817_v2  ;;  %p800_p1 = scmp.lt.s32.totalorder %s675_s9, %s675_s9 }
 0x27c   :  { %755 = vmatpush3.msk.msra.mxu0 %vm321_vm7, %v316_v30  ;;  %762 = vmatprep.mubr.msk.f32.mxu0 %vm819_vm1, %v817_v2 }
 0x27d   :  { %756 = vmatprep.subr.mxu0 %v817_v2  ;;  %777 = vmatpush3.msra.mxu1 %v571_v24 }
 0x27e   :  { %757 = vmatpush3.msra.mxu0 %v315_v31  ;;  %778 = vmatprep.subr.mxu1 %v817_v2  ;;  %v691_v31 = vld [vmem:[%s1016_s10] ss:$0 sm:$0xff]  ;;  %s795_s10 = scalar_lea.vmem %s675_s9, 32 }
 0x27f   :  { %758 = vmatprep.subr.mxu0 %v817_v2  ;;  %779 = vmatpush3.msra.mxu1 %v570_v25  ;;  %p796_p0 = scmp.ne.s32.totalorder %s675_s9, %s795_s10  ;;  %p801_p2 = scmp.lt.s32.totalorder %s795_s10, %s795_s10 }
 0x280   :  { %759 = vmatpush3.msra.mxu0 %v314_v32 }
 0x281   :  { %760 = vmatprep.subr.mxu0 %v817_v2  ;;  %p802_p3 = por %p801_p2, %p800_p1 }
 0x282   :  { %761 = vmatpush3.msra.mxu0 %v313_v33  ;;  %v236_v34 = vpop.permute.xlu1 %235 }
 0x283   :  { %765 = vmatprep.subr.mxu0 %v817_v2  ;;  %p803_p4 = pnand %p802_p3, %p796_p0 }
 0x33b   :  { %v308_v35 = vpop.f32.mrf.mxu0 }
 0x33c   :  { %v309_v36 = vadd.f32 %v308_v35, %v236_v34 }
 0x33d   :  { %v753_v37 = vpop.f32.mrf.mxu0 }
 0x33e   :  { %v312_v38 = vmax.f32 %v309_v36, 0.0 }
 0x340   :  { %763 = vmatmul.mubr.msk.f32.vlgmr.msra.gmra.mxu0 %vm317_vm8, %v312_v38 }
 0x341   :  { %769 = vmatprep.mubr.msk.f32.mxu0 %vm819_vm1, %v817_v2  ;;  %766 = vmatpush3.msra.mxu0 %v487_v50  ;;  %vm495_vm1 = vcmask 130048  }
 0x342   :  { %767 = vmatprep.subr.mxu0 %v817_v2 }
 0x343   :  { %768 = vmatpush3.msra.mxu0 %v486_v51 }
 0x400   :  { %v391_v39 = vpop.f32.mrf.mxu0 }
 0x401   :  { %v413_v40 = vsel %vm412_vm9, %v391_v39, -inf  ;;  %v399_v41 = vsel %vm398_vm10, %v391_v39, -inf  ;;  %v396_v42 = vcombine.high %v391_v39, %v391_v39  ;;  %v406_v44 = vsel %vm405_vm11, %v391_v39, -inf }
 0x402   :  { %414 = vmax.xlane.f32.xlu1 %v413_v40  ;;  %400 = vmax.xlane.f32.xlu0 %v399_v41  ;;  %v764_v43 = vpop.f32.mrf.mxu0  ;;  %v420_v47 = vsel %vm419_vm12, %v391_v39, -inf }
 0x403   :  { %v402_v45 = vsel %vm398_vm10, %v396_v42, -inf  ;;  %v409_v46 = vsel %vm405_vm11, %v396_v42, -inf  ;;  %v416_v48 = vsel %vm412_vm9, %v396_v42, -inf  ;;  %v423_v49 = vsel %vm419_vm12, %v396_v42, -inf }
 0x406   :  { %407 = vmax.xlane.f32.xlu0 %v406_v44  ;;  %403 = vmax.xlane.f32.xlu1 %v402_v45 }
 0x40a   :  { %410 = vmax.xlane.f32.xlu0 %v409_v46  ;;  %421 = vmax.xlane.f32.xlu1 %v420_v47 }
 0x40e   :  { %417 = vmax.xlane.f32.xlu0 %v416_v48 }
 0x412   :  { %424 = vmax.xlane.f32.xlu0 %v423_v49 }
 0x48b   :  { %v401_v54 = vpop.xlane.xlu0 %400  ;;  %v415_v56 = vpop.xlane.xlu1 %414 }
 0x48c   :  { %v460_v10 = vrot.slane %v415_v56, %v459_v1  ;;  %v433_v12 = vrot.slane %v401_v54, %v432_v3 }
 0x48f   :  { %v408_v57 = vpop.xlane.xlu0 %407  ;;  %v404_v61 = vpop.xlane.xlu1 %403 }
 0x490   :  { %v447_v6 = vrot.slane %v408_v57, %v446_v63  ;;  %v437_v7 = vrot.slane %v404_v61, %v432_v3 }
 0x492   :  { %v439_v16 = vsel %vm438_vm13, %v437_v7, %v433_v12 }
 0x493   :  { %v411_v62 = vpop.xlane.xlu0 %410  ;;  %v422_v11 = vpop.xlane.xlu1 %421 }
 0x494   :  { %v451_v4 = vrot.slane %v411_v62, %v446_v63  ;;  %v473_v17 = vrot.slane %v422_v11, %v472_v8 }
 0x496   :  { %v452_v13 = vsel %vm438_vm13, %v451_v4, %v447_v6 }
 0x497   :  { %v418_v5 = vpop.xlane.xlu0 %417  ;;  %v481_v19 = vsel %vm480_vm14, %v439_v16, %v452_v13 }
 0x498   :  { %v464_v9 = vrot.slane %v418_v5, %v459_v1 }
 0x49a   :  { %v465_v14 = vsel %vm438_vm13, %v464_v9, %v460_v10 }
 0x49b   :  { %v425_v15 = vpop.xlane.xlu0 %424  ;;  %v483_v20 = vsel %vm482_vm15, %v481_v19, %v465_v14 }
 0x49c   :  { %v477_v18 = vrot.slane %v425_v15, %v472_v8 }
 0x49e   :  { %v478_v21 = vsel %vm438_vm13, %v477_v18, %v473_v17 }
 0x49f   :  { %v485_v22 = vsel %vm484_vm0, %v483_v20, %v478_v21 }
 0x4a0   :  { %770 = vmatmul.mubr.msk.f32.vlgmr.msra.gmra.mxu0 %vm495_vm1, %v485_v22 }
 0x560   :  { %v565_v27 = vpop.f32.mrf.mxu0 }
 0x561   :  { %v566_v28 = vadd.f32 %v689_v26, %v565_v27 }
 0x562   :  { %v771_v29 = vpop.f32.mrf.mxu0 }
 0x563   :  { %v569_v30 = vmax.f32 %v566_v28, 0.0 }
 0x565   :  { %781 = vmatmul.mubr.msk.f32.vlgmr.msra.gmra.mxu1 %vm581_vm2, %v569_v30 }
 0x625   :  { %v651_v32 = vpop.f32.mrf.mxu1 }
 0x626   :  { %v652_v33 = vadd.f32 %v691_v31, %v651_v32 }
 0x627   :  { %v782_v34 = vpop.f32.mrf.mxu1 }
 0x628   :  { %v656_v2 = vsel %vm655_vm3, %v652_v33, -inf }
 0x629   :  { %657 = vmax.xlane.f32.xlu1 %v656_v2 }
 0x6b2   :  { %v658_v35 = vpop.xlane.xlu1 %657 }
 0x6b3   :  { %v659_v36 = vsub.f32 %v652_v33, %v658_v35 }
 0x6b5   :  { %v660_v37 = vmul.f32 1.442695, %v659_v36 }
 0x6b7   :  { %791 = vpow2.f32 %v660_v37 }
 0x6c4   :  { %v792_v38 = vpop.eup %791 }
 0x6c5   :  { %v662_v39 = vsel %vm655_vm3, %v792_v38, 0.0 }
 0x6c6   :  { %663 = vadd.xlane.f32.xlu0 %v662_v39 }
 0x74f   :  { %v664_v40 = vpop.xlane.xlu0 %663 }
 0x750   :  { %793 = vrcp.f32 %v664_v40 }
 0x75d   :  { %v794_v41 = vpop.eup %793 }
 0x75e   :  { %v666_v42 = vmul.f32 %v794_v41, %v792_v38 }
 0x760   :  { %667 = vst.msk [vmem:[#allocation2] sm:$0x3] %vm655_vm3, %v666_v42 }
 0x761   :  { %806 = shalt.err (!%p803_p4)
}
 0x762   :  { %677 = dma.vmem_to_hbm [thread:$0]  %s675_s9, 32, %s1017_s11, [#allocation3]  }
 0x763   :  { %815 = dma.done.wait [#allocation3], 32  }
 0x764   :  { %816 = vsyncadd [#allocation3], 4294967264 }
 0x765   :  { %681 = vsyncpa [#allocation3], 1 }

</bundles_post_ra>
